<compile_context>
chip_gen: v7x
topology: tpu7x:2x2x1
jax: 0.10.0
libtpu: 0.0.40
codegen_flags: <defaults>
</compile_context>

<pallas_src>
import functools
import math

import jax
import jax.numpy as jnp
from jax.experimental import pallas as pl
from jax.experimental.pallas import tpu as pltpu


# ---------------------------------------------------------------------------
# Kernel 1: tiled matmul (fused qkv projection and o projection).
# ---------------------------------------------------------------------------
def _matmul_kernel(x_ref, w_ref, o_ref, acc_ref):
    @pl.when(pl.program_id(2) == 0)
    def _():
        acc_ref[...] = jnp.zeros_like(acc_ref)

    acc_ref[...] += jnp.dot(x_ref[...], w_ref[...],
                            preferred_element_type=jnp.float32)

    @pl.when(pl.program_id(2) == pl.num_programs(2) - 1)
    def _():
        o_ref[...] = acc_ref[...].astype(o_ref.dtype)


def linear(x, w, *, tm=256, tn=256, tk=512):
    """y = x @ w with x: (M, K), w: (K, N). Operands stay in their native dtype (bf16-friendly)."""
    M, K = x.shape
    K2, N = w.shape
    assert K == K2
    tm, tn, tk = min(tm, M), min(tn, N), min(tk, K)
    # TODO(synk): arbitrary M = B*S that is not a multiple of the tile would need padding.
    assert M % tm == 0 and N % tn == 0 and K % tk == 0
    return pl.pallas_call(
        _matmul_kernel,
        out_shape=jax.ShapeDtypeStruct((M, N), x.dtype),
        grid_spec=pltpu.PrefetchScalarGridSpec(
            num_scalar_prefetch=0,
            grid=(M // tm, N // tn, K // tk),
            in_specs=[
                pl.BlockSpec((tm, tk), lambda i, j, k: (i, k)),
                pl.BlockSpec((tk, tn), lambda i, j, k: (k, j)),
            ],
            out_specs=pl.BlockSpec((tm, tn), lambda i, j, k: (i, j)),
            scratch_shapes=[pltpu.VMEM((tm, tn), jnp.float32)],
        ),
        compiler_params=pltpu.CompilerParams(
            dimension_semantics=("parallel", "parallel", "arbitrary"),
            vmem_limit_bytes=64 * 1024 * 1024),
    )(x, w)


# ---------------------------------------------------------------------------
# Kernel 2: fused RoPE + flash attention (online softmax, GQA fold, causal skip).
# ---------------------------------------------------------------------------
def _fused_attn_kernel(qpos_ref, kpos_ref, inv_ref, q_ref, k_ref, v_ref, *rest,
                       n_rep, scale, tq, tk, causal, has_mask):
    if has_mask:
        mask_ref, o_ref, qrot_scr, m_scr, l_scr, acc_scr = rest
    else:
        mask_ref = None
        o_ref, qrot_scr, m_scr, l_scr, acc_scr = rest

    qi = pl.program_id(2)
    ki = pl.program_id(3)
    half = inv_ref.shape[-1]
    D = 2 * half
    inv = inv_ref[...]                                     # (1, half) f32

    def rope_tables(pos_ref):
        # cos/sin only on the unique half (emb = concat(freqs, freqs)) -> half the EUP work;
        # rotate_half's sign is baked into the sin table so the rotation is
        # x * cos_full + roll(x, D/2) * sin_signed (roll = XLU slot, co-issues with VPU).
        pos = pos_ref[0].astype(jnp.float32)               # (T, 1), positions on sublanes
        f = pos * inv                                       # (T, half)
        c = jnp.cos(f)
        s = jnp.sin(f)
        cos_full = jnp.concatenate([c, c], axis=-1)         # (T, D)
        sin_signed = jnp.concatenate([-s, s], axis=-1)
        return cos_full, sin_signed

    # ---- per (b, kv-group, q-tile) init: zero stats, rotate + pre-scale q ONCE, reuse over ki.
    @pl.when(ki == 0)
    def _init():
        m_scr[...] = jnp.full_like(m_scr, -jnp.inf)
        l_scr[...] = jnp.zeros_like(l_scr)
        acc_scr[...] = jnp.zeros_like(acc_scr)
        cos_q, sin_q = rope_tables(qpos_ref)
        cos_q = cos_q * scale                               # fold 1/sqrt(D) into q once
        sin_q = sin_q * scale
        qt = q_ref[0].astype(jnp.float32)                   # (tq, n_rep*D)
        for r in range(n_rep):
            x = qt[:, r * D:(r + 1) * D]
            rot = x * cos_q + pltpu.roll(x, half, axis=1) * sin_q
            qrot_scr[:, r * D:(r + 1) * D] = rot.astype(qrot_scr.dtype)

    def _accumulate():
        cos_k, sin_k = rope_tables(kpos_ref)
        vt = v_ref[0]                                        # (tk, D), native dtype
        kt = k_ref[0].astype(jnp.float32)                    # (tk, D)
        k_rot = (kt * cos_k + pltpu.roll(kt, half, axis=1) * sin_k).astype(vt.dtype)

        if has_mask:
            bias = mask_ref[0, 0].astype(jnp.float32)        # (tq, tk) additive mask
        elif causal:
            q_idx = qi * tq + jax.lax.broadcasted_iota(jnp.int32, (tq, tk), 0)
            k_idx = ki * tk + jax.lax.broadcasted_iota(jnp.int32, (tq, tk), 1)
            bias = jnp.where(k_idx <= q_idx, 0.0, -1e30).astype(jnp.float32)
        else:
            bias = None

        # The n_rep query heads of this KV group reuse the same resident k_rot / vt tile.
        for r in range(n_rep):
            q_r = qrot_scr[:, r * D:(r + 1) * D]             # (tq, D), pre-scaled, native dtype
            sc = jax.lax.dot_general(q_r, k_rot, (((1,), (1,)), ((), ())),
                                     preferred_element_type=jnp.float32)
            if bias is not None:
                sc = sc + bias
            m_prev = m_scr[r]
            m_new = jnp.maximum(m_prev, sc.max(axis=-1, keepdims=True))
            alpha = jnp.exp(m_prev - m_new)
            p = jnp.exp(sc - m_new)
            l_scr[r] = alpha * l_scr[r] + p.sum(axis=-1, keepdims=True)
            acc_scr[r] = alpha * acc_scr[r] + jnp.dot(
                p.astype(vt.dtype), vt, preferred_element_type=jnp.float32)
            m_scr[r] = m_new

    if causal:
        # Skip kv tiles strictly above the causal diagonal (their index_maps are clamped, so
        # the pipeline also avoids fresh DMAs for them).
        last_needed = (qi * tq + tq - 1) // tk
        pl.when(ki <= last_needed)(_accumulate)
    else:
        _accumulate()

    @pl.when(ki == pl.num_programs(3) - 1)
    def _finalize():
        for r in range(n_rep):
            inv_l = pl.reciprocal(l_scr[r], approx=True)
            o_ref[0, r] = (acc_scr[r] * inv_l).astype(o_ref.dtype)
        # TODO(synk): attention dropout (config.attention_dropout=0.0, eval) is a no-op.


def fused_rope_flash_attention(qkv, position_ids, inv_freq, attention_mask, *,
                               num_heads, num_kv_heads, head_dim,
                               causal=True, tq=256, tk=256):
    """qkv: (B, S, (H + 2*Hkv)*D) fused projection output (q heads, then k heads, then v heads).

    Returns attention output in (B, H, S, D) layout (the module then does a literal flat view).
    """
    B, S, _ = qkv.shape
    D = head_dim
    H, Hkv = num_heads, num_kv_heads
    n_rep = H // Hkv
    tq, tk = min(tq, S), min(tk, S)
    assert S % tq == 0 and S % tk == 0 and D % 2 == 0
    half = D // 2
    scale = 1.0 / math.sqrt(D)
    has_mask = attention_mask is not None

    pos = position_ids.astype(jnp.int32).reshape(B, S, 1)       # S on sublanes
    inv2d = inv_freq.reshape(1, half).astype(jnp.float32)

    if causal:
        def kvb(q_i, k_i):
            return jnp.minimum(k_i, (q_i * tq + tq - 1) // tk)   # clamp past the diagonal
    else:
        def kvb(q_i, k_i):
            return k_i

    in_specs = [
        pl.BlockSpec((1, tq, 1), lambda b, g, q_i, k_i: (b, q_i, 0)),            # q positions
        pl.BlockSpec((1, tk, 1), lambda b, g, q_i, k_i: (b, kvb(q_i, k_i), 0)),  # k positions
        pl.BlockSpec((1, half), lambda b, g, q_i, k_i: (0, 0)),                  # inv_freq
        # q/k/v are read directly from the fused projection output: no XLA transposes,
        # GQA / repeat_kv is expressed purely in the index_maps.
        pl.BlockSpec((1, tq, n_rep * D), lambda b, g, q_i, k_i: (b, q_i, g)),               # q group
        pl.BlockSpec((1, tk, D), lambda b, g, q_i, k_i: (b, kvb(q_i, k_i), H + g)),         # k head
        pl.BlockSpec((1, tk, D), lambda b, g, q_i, k_i: (b, kvb(q_i, k_i), H + Hkv + g)),   # v head
    ]
    args = [pos, pos, inv2d, qkv, qkv, qkv]
    if has_mask:
        in_specs.append(pl.BlockSpec((1, 1, tq, tk),
                                     lambda b, g, q_i, k_i: (b, 0, q_i, kvb(q_i, k_i))))
        args.append(attention_mask)

    kernel = functools.partial(_fused_attn_kernel, n_rep=n_rep, scale=scale,
                               tq=tq, tk=tk, causal=causal, has_mask=has_mask)
    return pl.pallas_call(
        kernel,
        out_shape=jax.ShapeDtypeStruct((B, H, S, D), qkv.dtype),
        grid_spec=pltpu.PrefetchScalarGridSpec(
            num_scalar_prefetch=0,
            grid=(B, Hkv, S // tq, S // tk),
            in_specs=in_specs,
            out_specs=pl.BlockSpec((1, n_rep, tq, D),
                                   lambda b, g, q_i, k_i: (b, g, q_i, 0)),
            scratch_shapes=[
                pltpu.VMEM((tq, n_rep * D), qkv.dtype),   # RoPE'd + pre-scaled q (resident over ki)
                pltpu.VMEM((n_rep, tq, 1), jnp.float32),  # running max per head
                pltpu.VMEM((n_rep, tq, 1), jnp.float32),  # running denominator per head
                pltpu.VMEM((n_rep, tq, D), jnp.float32),  # f32 accumulators per head
            ]),
        compiler_params=pltpu.CompilerParams(
            dimension_semantics=("parallel", "parallel", "parallel", "arbitrary"),
            vmem_limit_bytes=64 * 1024 * 1024),
    )(*args)


# ---------------------------------------------------------------------------
# GemmaAttention forward wrapper.
# ---------------------------------------------------------------------------
def make_inv_freq(dim, base=10000.0):
    # Standard RoPE (matches HF GemmaRotaryEmbedding): 1 / base ** (arange(0,d,2) / d).
    exponent = jnp.arange(0, dim, 2, dtype=jnp.float32) / jnp.float32(dim)
    return 1.0 / (jnp.float32(base) ** exponent)


def gemma_attention(hidden_states, attention_mask, position_ids,
                    wq, wk, wv, wo, *, num_heads, num_kv_heads, head_dim,
                    rope_theta=10000.0, causal=True, q_block=256, k_block=256):
    """attention_mask: additive (B,1,S,S) mask, or None to use the in-kernel causal mask.
    causal=True additionally skips fully-masked kv blocks (assumes the mask is at least causal)."""
    B, S, hidden = hidden_states.shape
    D = head_dim
    x2d = hidden_states.reshape(B * S, hidden)

    # Fused q/k/v projection: x streamed from HBM once, one pipeline ramp (attention_bias=False).
    wqkv = jnp.concatenate([wq, wk, wv], axis=1)
    qkv = linear(x2d, wqkv).reshape(B, S, (num_heads + 2 * num_kv_heads) * D)

    inv_freq = make_inv_freq(D, rope_theta)
    # TODO(synk): KVCache.update path not implemented (kv_cache=None case only).
    attn = fused_rope_flash_attention(
        qkv, position_ids, inv_freq, attention_mask,
        num_heads=num_heads, num_kv_heads=num_kv_heads, head_dim=D,
        causal=causal, tq=q_block, tk=k_block)

    # Literal replication of the spec: .view(bsz, q_len, -1) with NO transpose(1, 2)
    # (a flat reshape of the contiguous (B, H, S, D) buffer — no data movement).
    attn2d = attn.reshape(B * S, num_heads * D)
    out = linear(attn2d, wo).reshape(B, S, hidden)
    # TODO(synk): attn_weights (second return value of the module) are never materialized;
    # the online-softmax flash kernel makes the full (B,H,S,S) matrix unnecessary.
    return out


# ---------------------------------------------------------------------------
# Pure-JAX reference replicating the PyTorch forward semantics.
# ---------------------------------------------------------------------------
def _reference_forward(hidden_states, attention_mask, position_ids,
                       wq, wk, wv, wo, *, num_heads, num_kv_heads, head_dim,
                       rope_theta=10000.0):
    B, S, _ = hidden_states.shape
    n_rep = num_heads // num_kv_heads
    q = (hidden_states @ wq).reshape(B, S, num_heads, head_dim).transpose(0, 2, 1, 3)
    k = (hidden_states @ wk).reshape(B, S, num_kv_heads, head_dim).transpose(0, 2, 1, 3)
    v = (hidden_states @ wv).reshape(B, S, num_kv_heads, head_dim).transpose(0, 2, 1, 3)

    inv_freq = make_inv_freq(head_dim, rope_theta)
    freqs = position_ids.astype(jnp.float32)[:, :, None] * inv_freq[None, None, :]
    emb = jnp.concatenate([freqs, freqs], axis=-1)
    cos = jnp.cos(emb)[:, None]
    sin = jnp.sin(emb)[:, None]

    def rotate_half(x):
        h = x.shape[-1] // 2
        return jnp.concatenate([-x[..., h:], x[..., :h]], axis=-1)

    q = q * cos + rotate_half(q) * sin
    k = k * cos + rotate_half(k) * sin

    def repeat_kv(x, n):
        if n == 1:
            return x
        b, h, s, d = x.shape
        return jnp.broadcast_to(x[:, :, None], (b, h, n, s, d)).reshape(b, h * n, s, d)

    k = repeat_kv(k, n_rep)
    v = repeat_kv(v, n_rep)

    scores = jnp.einsum("bhqd,bhkd->bhqk", q, k) / math.sqrt(head_dim)
    scores = scores + attention_mask
    w = jax.nn.softmax(scores.astype(jnp.float32), axis=-1).astype(q.dtype)
    attn = jnp.einsum("bhqk,bhkd->bhqd", w, v)
    attn = attn.reshape(B, S, num_heads * head_dim)   # literal .view, no transpose
    return attn @ wo


if __name__ == "__main__":
    key = jax.random.PRNGKey(0)
    B, S = 2, 256
    hidden_size = 256
    num_heads = 4
    num_kv_heads = 2          # GQA: n_rep = 2
    head_dim = 128
    rope_theta = 10000.0
    dtype = jnp.float32

    k0, k1, k2, k3, k4 = jax.random.split(key, 5)
    hidden_states = jax.random.normal(k0, (B, S, hidden_size), dtype=dtype)
    wq = jax.random.normal(k1, (hidden_size, num_heads * head_dim), dtype=dtype) * 0.02
    wk = jax.random.normal(k2, (hidden_size, num_kv_heads * head_dim), dtype=dtype) * 0.02
    wv = jax.random.normal(k3, (hidden_size, num_kv_heads * head_dim), dtype=dtype) * 0.02
    wo = jax.random.normal(k4, (num_heads * head_dim, hidden_size), dtype=dtype) * 0.02

    position_ids = jnp.broadcast_to(jnp.arange(S, dtype=jnp.int32)[None, :], (B, S))
    causal = jnp.tril(jnp.ones((S, S), dtype=bool))
    attention_mask = jnp.broadcast_to(
        jnp.where(causal, 0.0, -1e9).astype(jnp.float32)[None, None], (B, 1, S, S))

    common = dict(num_heads=num_heads, num_kv_heads=num_kv_heads,
                  head_dim=head_dim, rope_theta=rope_theta,
                  q_block=128, k_block=128)

    # Path 1: additive mask streamed from HBM (module-faithful) + causal block skip.
    out = gemma_attention(hidden_states, attention_mask, position_ids,
                          wq, wk, wv, wo, causal=True, **common)
    out = jax.block_until_ready(out)

    # Path 2: no materialized mask — causal mask generated in-kernel via broadcasted_iota.
    out_nomask = gemma_attention(hidden_states, None, position_ids,
                                 wq, wk, wv, wo, causal=True, **common)
    out_nomask = jax.block_until_ready(out_nomask)

    with jax.default_matmul_precision("highest"):
        out_ref = _reference_forward(hidden_states, attention_mask, position_ids,
                                     wq, wk, wv, wo,
                                     num_heads=num_heads, num_kv_heads=num_kv_heads,
                                     head_dim=head_dim, rope_theta=rope_theta)
    out_ref = jax.block_until_ready(out_ref)

    assert out.shape == (B, S, hidden_size) and out.dtype == dtype
    err = float(jnp.max(jnp.abs(out - out_ref)))
    assert jnp.allclose(out, out_ref, atol=2e-2, rtol=2e-2), (
        "masked path mismatch, max abs diff = %s" % err)
    err2 = float(jnp.max(jnp.abs(out_nomask - out_ref)))
    assert jnp.allclose(out_nomask, out_ref, atol=2e-2, rtol=2e-2), (
        "in-kernel causal path mismatch, max abs diff = %s" % err2)

    print("KERNEL_OK")
</pallas_src>

<mosaic_0001>
module attributes {stable_mosaic.version = 11 : i64} {
  func.func @_matmul_kernel(%arg0: i32, %arg1: i32, %arg2: i32, %arg3: memref<256x256xf32, #tpu.memory_space<vmem>>, %arg4: memref<256x256xf32, #tpu.memory_space<vmem>>, %arg5: memref<256x256xf32, #tpu.memory_space<vmem>>, %arg6: memref<256x256xf32, #tpu.memory_space<vmem>>) attributes {dimension_semantics = [#tpu.dimension_semantics<parallel>, #tpu.dimension_semantics<parallel>, #tpu.dimension_semantics<arbitrary>], iteration_bounds = array<i64: 2, 4, 1>, scalar_prefetch = 0 : i64, scratch_operands = 1 : i64, tpu.core_type = #tpu.core_type<tc>, window_params = [{transform_indices = @transform_0, window_bounds = array<i64: 256, 256>}, {transform_indices = @transform_1, window_bounds = array<i64: 256, 256>}, {transform_indices = @transform_2, window_bounds = array<i64: 256, 256>}]} {
    %c0_i32 = arith.constant 0 : i32
    %0 = arith.cmpi eq, %arg2, %c0_i32 : i32
    %1 = arith.extui %0 : i1 to i32
    %c0_i32_0 = arith.constant 0 : i32
    %2 = arith.cmpi ne, %1, %c0_i32_0 : i32
    scf.if %2 {
      %cst_10 = arith.constant 0.000000e+00 : f32
      %12 = vector.broadcast %cst_10 : f32 to vector<256x256xf32>
      %c0_11 = arith.constant 0 : index
      %c0_12 = arith.constant 0 : index
      %13 = vector.load %arg6[%c0_11, %c0_12] : memref<256x256xf32, #tpu.memory_space<vmem>>, vector<256x256xf32>
      tpu.vector_store %arg6[%c0_11, %c0_12], %12 {strides = array<i32>} : memref<256x256xf32, #tpu.memory_space<vmem>>, vector<256x256xf32>,
    } else {
    }
    %c0 = arith.constant 0 : index
    %c0_1 = arith.constant 0 : index
    %3 = vector.load %arg6[%c0, %c0_1] : memref<256x256xf32, #tpu.memory_space<vmem>>, vector<256x256xf32>
    %c0_2 = arith.constant 0 : index
    %c0_3 = arith.constant 0 : index
    %4 = vector.load %arg3[%c0_2, %c0_3] : memref<256x256xf32, #tpu.memory_space<vmem>>, vector<256x256xf32>
    %c0_4 = arith.constant 0 : index
    %c0_5 = arith.constant 0 : index
    %5 = vector.load %arg4[%c0_4, %c0_5] : memref<256x256xf32, #tpu.memory_space<vmem>>, vector<256x256xf32>
    %cst = arith.constant dense<0.000000e+00> : vector<256x256xf32>
    %6 = tpu.matmul %4, %5, %cst {dimension_numbers = #tpu.dot_dimension_numbers<[1], [0], [0], [1], [0, 0, 1, 1], [], []>} : vector<256x256xf32>, vector<256x256xf32>, vector<256x256xf32> -> vector<256x256xf32>
    %7 = arith.addf %3, %6 : vector<256x256xf32>
    %c0_6 = arith.constant 0 : index
    %c0_7 = arith.constant 0 : index
    %8 = vector.load %arg6[%c0_6, %c0_7] : memref<256x256xf32, #tpu.memory_space<vmem>>, vector<256x256xf32>
    tpu.vector_store %arg6[%c0_6, %c0_7], %7 {strides = array<i32>} : memref<256x256xf32, #tpu.memory_space<vmem>>, vector<256x256xf32>,
    %c0_i32_8 = arith.constant 0 : i32
    %9 = arith.cmpi eq, %arg2, %c0_i32_8 : i32
    %10 = arith.extui %9 : i1 to i32
    %c0_i32_9 = arith.constant 0 : i32
    %11 = arith.cmpi ne, %10, %c0_i32_9 : i32
    scf.if %11 {
      %c0_10 = arith.constant 0 : index
      %c0_11 = arith.constant 0 : index
      %12 = vector.load %arg6[%c0_10, %c0_11] : memref<256x256xf32, #tpu.memory_space<vmem>>, vector<256x256xf32>
      %c0_12 = arith.constant 0 : index
      %c0_13 = arith.constant 0 : index
      %13 = vector.load %arg5[%c0_12, %c0_13] : memref<256x256xf32, #tpu.memory_space<vmem>>, vector<256x256xf32>
      tpu.vector_store %arg5[%c0_12, %c0_13], %12 {strides = array<i32>} : memref<256x256xf32, #tpu.memory_space<vmem>>, vector<256x256xf32>,
    } else {
    }
    return
  }
  func.func @transform_0(%arg0: i32, %arg1: i32, %arg2: i32) -> (i32, i32) {
    %c0_i32 = arith.constant 0 : i32
    return %arg0, %arg2 : i32, i32
  }
  func.func @transform_1(%arg0: i32, %arg1: i32, %arg2: i32) -> (i32, i32) {
    %c0_i32 = arith.constant 0 : i32
    return %arg2, %arg1 : i32, i32
  }
  func.func @transform_2(%arg0: i32, %arg1: i32, %arg2: i32) -> (i32, i32) {
    %c0_i32 = arith.constant 0 : i32
    return %arg0, %arg1 : i32, i32
  }
}

</mosaic_0001>

<bundles_post_ra>
// kernel: tpu_custom_call.1
= control target key start
LH: loop header
LB: loop body
LE: loop exit
PB: predicated region body
PF: predicated region fallthrough
CT: control target
= control target key end

     0   :  { %s2194_s0 = inlined_call_operand.hbm [shape: f32[512,256], index: 0, kind: input, shape index: {}]   ;;  %s2195_s1 = inlined_call_operand.hbm [shape: f32[256,1024], index: 1, kind: input, shape index: {}]   ;;  %s2196_s2 = inlined_call_operand.hbm [shape: f32[512,1024], index: 2, kind: output, shape index: {}]  }
   0x1   :  { %2210 = sst [smem:[#allocation18_spill]] %s2194_s0 }
   0x2   :  { %2211 = sst [smem:[#allocation19_spill]] %s2196_s2 }
   0x3   :  { %7 = vsyncpa [#allocation4], 0 }
   0x4   :  { %9 = vsyncpa [#allocation4 + $0x1], 0 }
   0x5   :  { %10 = vsyncpa [#allocation7], 0 }
   0x6   :  { %12 = vsyncpa [#allocation7 + $0x1], 0 }
   0x7   :  { %13 = vsyncpa [#allocation5], 0 }
   0x8   :  { %15 = vsyncpa [#allocation5 + $0x1], 0  ;;  %s1646_s9 = smov 0   ;;  %s1648_s10 = smov 0  }
   0x9   :  { %s1650_s11 = smov 0   ;;  %s1652_s12 = smov 0  }
   0xa   :  { %s1654_s13 = smov 0   ;;  %s1656_s14 = smov 0  }
   0xb   :  { %s1658_s15 = smov 0   ;;  %s1660_s16 = smov 0  }
   0xc   :  { %s1662_s17 = smov 0   ;;  %s1664_s18 = smov 0  }
   0xd   :  { %s1666_s19 = smov 0   ;;  %s1668_s20 = smov 0  }
   0xe   :  { %s1670_s21 = smov 0   ;;  %s1672_s22 = smov 0  }
   0xf LB: > { %2212 = sst [smem:[#allocation12_spill]] %s1608_s19  ;;  %s1151_s23 = sadd.s32 4294967295, %s1620_s22   ;;  %s1620_s22 = sphi %s1672_s22, %s21_s22   ;;  %s1616_s21 = sphi %s1670_s21, %s2246_s21   ;;  %s1612_s20 = sphi %s1668_s20, %s2258_s20   ;;  %s1608_s19 = sphi %s1666_s19, %s2257_s19   ;;  %s1604_s18 = sphi %s1664_s18, %s2256_s18   ;;  %s1600_s17 = sphi %s1662_s17, %s2255_s17   ;;  %s1596_s16 = sphi %s1660_s16, %s2254_s16   ;;  %s1592_s15 = sphi %s1658_s15, %s2253_s15   ;;  %s1588_s14 = sphi %s1656_s14, %s2252_s14   ;;  %s1584_s13 = sphi %s1654_s13, %s2251_s13   ;;  %s1580_s12 = sphi %s1652_s12, %s2250_s12   ;;  %s1576_s11 = sphi %s1650_s11, %s2249_s11   ;;  %s1572_s10 = sphi %s1648_s10, %s2248_s10   ;;  %s1568_s9 = sphi %s1646_s9, %s2247_s9  }
  0x10   : > { %2213 = sst [smem:[#allocation13_spill]] %s1616_s21  ;;  %s40_s24 = sadd.s32 1, %s1616_s21 }
  0x11   : > { %p56_p0 = scmp.ne.s32.totalorder %s1600_s17, %s1596_s16  ;;  %p2198_p1 = scmp.eq.s32.totalorder %s1620_s22, 0 }
  0x12   : > { %p62_p2 = scmp.ne.s32.totalorder %s1596_s16, %s1592_s15  ;;  %p1721_p3 = scmp.eq.s32.totalorder %s1151_s23, 0 }
  0x13   : > { %p1725_p4 = scmp.eq.s32.totalorder %s1151_s23, 7  ;;  %p58_p5 = por %p2198_p1, %p56_p0 }
  0x14   : > { %p1733_p6 = por %p1721_p3, %p62_p2  ;;  %p2197_p7 = scmp.lt.s32.totalorder %s1620_s22, 8 }
  0x15   : > { %s2215_s27 = scalar_select %p1725_p4, 1, 0 }
  0x16   : > { %s2216_s28 = scalar_select %p1733_p6, 1, 0 }
  0x17   : > { %s142_s29 = sand.u32 1, %s1600_s17   ;;  %s1174_s30 = sshll.u32 %s1616_s21, 13 }
  0x18   : > { %s1155_s3 = sshll.u32 %s142_s29, 9  ;;  %s2217_s0 = sld [smem:[#allocation18_spill]] }
  0x19   : > { %s146_s7 = scalar_lea.vmem [#allocation3], %s1155_s3  ;;  %p1747_p8 = pnand %p2197_p7, %p58_p5 }
  0x1a   : > { %s156_s8 = sshll.u32 %s146_s7, 4  ;;  %s1753_s23 = scalar_lea.sflag [#allocation4], %s142_s29  ;;  %s1751_s8 = int_to_ptr.vmem [resolvable:$true] %s156_s8 }
  0x1b   : > { %p1412_p10 = pneg %p1747_p8 }
  0x1e   : > { %s1743_s6 = scalar_lea.hbm %s2217_s0, %s1174_s30  ;;  %s1415_s5 = scalar_lea.hbm %s2217_s0, 16384 }
  0x1f   : > { %s1410_s4 = scalar_lea.hbm %s1743_s6, 8192  ;;  %p1416_p13 = scmp.lt.u32.totalorder %s1743_s6, %s2217_s0 }
  0x20   : > { %p1411_p9 = scmp.ne.s32.totalorder %s1743_s6, %s1410_s4  ;;  %p1417_p0 = scmp.lt.u32.totalorder %s1415_s5, %s1410_s4 }
  0x21   : > { %p1419_p5 = scmp.lt.u32.totalorder %s1410_s4, %s1743_s6 }
  0x22   : > { %p1413_p11 = pnand %p1412_p10, %p1411_p9  ;;  %p1418_p2 = por %p1417_p0, %p1416_p13 }
  0x24   : > { %p1414_p12 = pneg %p1413_p11  ;;  %p1420_p7 = por %p1419_p5, %p1418_p2 }
  0x26   : > { %p1421_p1 = pnand %p1420_p7, %p1414_p12 }
  0x28   : > { %1424 = shalt.err (!%p1421_p1)
}
  0x29   : > { %s1425_s29 = scalar_lea.vmem %s1751_s8, 8192  ;;  %s1622_s30 = smov [#allocation3]  }
  0x2a   : > { %p1426_p9 = scmp.ne.s32.totalorder %s1751_s8, %s1425_s29  ;;  %s1430_s3 = sshll.u32 %s1622_s30, 4  ;;  %s1431_s3 = int_to_ptr.vmem [resolvable:$false] %s1430_s3 }
  0x2b   : > { %s1432_s25 = scalar_lea.vmem %s1431_s3, 16384  ;;  %p1433_p4 = scmp.lt.s32.totalorder %s1751_s8, %s1431_s3 }
  0x2c   : > { %p1428_p11 = pnand %p1426_p9, %p1412_p10  ;;  %p1434_p13 = scmp.lt.s32.totalorder %s1432_s25, %s1425_s29 }
  0x2e   : > { %p1429_p6 = pneg %p1428_p11  ;;  %p1435_p0 = por %p1434_p13, %p1433_p4 }
  0x30   : > { %p1436_p2 = pnand %p1435_p0, %p1429_p6 }
  0x32   : > { %1439 = shalt.err (!%p1436_p2)
}
  0x33   : > { %s2200_s4 = smov 256   ;;  %s2201_s5 = smov 16  }
  0x34   : > { %1282 = dma.hbm_to_vmem [thread:$0]  (!%p1747_p8), %s1743_s6, 8192, %s1751_s8, %s1753_s23, %s2200_s4, %s2200_s4, %s2201_s5  }
  0x35   : > { %p1162_p1 = scmp.ge.s32.totalorder %s1620_s22, 1  ;;  %p188_p4 = scmp.lt.s32.totalorder %s1620_s22, 9 }
  0x36   : > { %s1152_s29 = sadd.s32 4294967294, %s1620_s22   ;;  %s36_s30 = sadd.s32 1, %s1612_s20 }
  0x37   : > { %p1786_p6 = pnand %p1162_p1, %p188_p4  ;;  %s77_s3 = sadd.s32 1, %s1588_s14 }
  0x38   : > { %p38_p7 = scmp.ge.s32.totalorder %s36_s30, 4  ;;  %p84_p10 = scmp.ne.s32.totalorder %s1588_s14, %s1584_s13 }
  0x39   : > { %p90_p12 = scmp.ne.s32.totalorder %s1584_s13, %s1580_s12  ;;  %s105_s15 = sadd.s32 1, %s1576_s11 }
  0x3a   : > { %s2260_s30 = smov (%p38_p7, %s36_s30), 0  ;;  %s2262_s24 = smov (!%p38_p7, %s40_s24), %s1616_s21 }
  0x3b   : > { %2220 = sst [smem:[#allocation14_spill]] %s2260_s30  ;;  %s73_s6 = ssub.s32 %s1612_s20, %s2260_s30 }
  0x3c   : > { %p2221_p8 = scmp.eq.s32.totalorder %s1620_s22, 0  ;;  %p42_p9 = scmp.ge.s32.totalorder %s2262_s24, 2 }
  0x3d   : > { %p75_p11 = scmp.eq.s32.totalorder %s73_s6, 0  ;;  %p1813_p13 = por %p90_p12, %p1721_p3 }
  0x3e   : > { %p1807_p5 = por %p84_p10, %p2221_p8  ;;  %p115_p0 = scmp.ne.s32.totalorder %s1576_s11, %s1572_s10 }
  0x3f   : > { %s2223_s12 = scalar_select %p1813_p13, 1, 0 }
  0x40   : > { %s2264_s24 = smov (%p42_p9, %s2262_s24), 0  ;;  %p2226_p2 = scmp.ne.s32.totalorder %s2215_s27, 0 }
  0x41   : > { %2224 = sst [smem:[#allocation15_spill]] %s2264_s24  ;;  %s44_s25 = ssub.s32 %s1616_s21, %s2264_s24 }
  0x42   : > { %s1822_s23 = scalar_select %p75_p11, %s1588_s14, %s77_s3  }
  0x43   : > { %p1828_p1 = por %p2226_p2, %p115_p0  ;;  %p47_p4 = scmp.eq.s32.totalorder %s44_s25, 0 }
  0x44   : > { %2225 = sst [smem:[#allocation16_spill]] %s1822_s23  ;;  %s102_s26 = sor.u32 %s73_s6, %s44_s25 }
  0x45   : > { %s2227_s4 = scalar_select %p1828_p1, 1, 0 }
  0x46   : > { %p103_p3 = scmp.eq.s32.totalorder %s102_s26, 0  ;;  %p121_p7 = scmp.ne.s32.totalorder %s1572_s10, %s1568_s9 }
  0x47   : > { %2228 = sst [smem:[#allocation17_spill]] %s2227_s4  ;;  %s2229_s5 = sadd.s32 1, %s1600_s17 }
  0x48   : > { %s1837_s0 = scalar_select %p47_p4, %s1600_s17, %s2229_s5  }
  0x49   : > { %s1840_s30 = scalar_select %p103_p3, %s1576_s11, %s105_s15  }
  0x4a   : > { %p122_p10 = scmp.eq.s32.totalorder %s1152_s29, 7  ;;  %s166_s3 = sand.u32 1, %s1588_s14  }
  0x4b   : > { %s1159_s23 = sshll.u32 %s166_s3, 9  ;;  %s1175_s24 = sshll.u32 %s1612_s20, 8 }
  0x4c   : > { %p1843_p12 = por %p122_p10, %p121_p7  ;;  %s170_s21 = scalar_lea.vmem [#allocation6], %s1159_s23 }
  0x4d   : > { %s180_s2 = sshll.u32 %s170_s21, 4  ;;  %s1851_s6 = scalar_lea.hbm %s2195_s1, %s1175_s24  ;;  %s1853_s2 = int_to_ptr.vmem [resolvable:$true] %s180_s2 }
  0x4e   : > { %s2230_s27 = scalar_select %p1843_p12, 1, 0 }
  0x4f   : > { %p2231_p8 = scmp.lt.s32.totalorder %s1620_s22, 8  ;;  %s1863_s21 = scalar_lea.sflag [#allocation7], %s166_s3 }
  0x50   : > { %s1440_s29 = scalar_lea.hbm %s1851_s6, 8192  ;;  %s1445_s4 = scalar_lea.hbm %s2195_s1, 32768 }
  0x51   : > { %p1859_p9 = pnand %p2231_p8, %p1807_p5  ;;  %p1441_p11 = scmp.ne.s32.totalorder %s1851_s6, %s1440_s29 }
  0x52   : > { %p1446_p5 = scmp.lt.u32.totalorder %s1851_s6, %s2195_s1  ;;  %p1447_p3 = scmp.lt.u32.totalorder %s1445_s4, %s1440_s29 }
  0x53   : > { %p1442_p0 = pneg %p1859_p9  ;;  %p1449_p10 = scmp.lt.u32.totalorder %s1440_s29, %s1851_s6 }
  0x54   : > { %p1448_p7 = por %p1447_p3, %p1446_p5 }
  0x55   : > { %p1443_p2 = pnand %p1442_p0, %p1441_p11 }
  0x56   : > { %p1450_p8 = por %p1449_p10, %p1448_p7 }
  0x57   : > { %p1444_p4 = pneg %p1443_p2 }
  0x59   : > { %p1451_p12 = pnand %p1450_p8, %p1444_p4 }
  0x5b   : > { %1454 = shalt.err (!%p1451_p12)
}
  0x5c   : > { %s1455_s23 = scalar_lea.vmem %s1853_s2, 8192  ;;  %s1625_s25 = smov [#allocation6]  }
  0x5d   : > { %p1456_p11 = scmp.ne.s32.totalorder %s1853_s2, %s1455_s23  ;;  %s1460_s26 = sshll.u32 %s1625_s25, 4  ;;  %s1461_s26 = int_to_ptr.vmem [resolvable:$false] %s1460_s26 }
  0x5e   : > { %s1462_s3 = scalar_lea.vmem %s1461_s26, 16384  ;;  %p1463_p13 = scmp.lt.s32.totalorder %s1853_s2, %s1461_s26 }
  0x5f   : > { %p1458_p2 = pnand %p1456_p11, %p1442_p0  ;;  %p1464_p5 = scmp.lt.s32.totalorder %s1462_s3, %s1455_s23 }
  0x61   : > { %p1459_p1 = pneg %p1458_p2  ;;  %p1465_p3 = por %p1464_p5, %p1463_p13 }
  0x63   : > { %p1466_p7 = pnand %p1465_p3, %p1459_p1 }
  0x65   : > { %1469 = shalt.err (!%p1466_p7)
}
  0x66   : > { %s1626_s29 = smov 1024   ;;  %s2233_s19 = smov 16  }
  0x67   : > { %s2234_s24 = smov 256   ;;  %192 = sbr.rel (%p1786_p6) target bundleno = 471 (0x1d7), region = 28 }
  0x68   : > { %1285 = dma.hbm_to_vmem [thread:$0]  (!%p1859_p9), %s1851_s6, 8192, %s1853_s2, %s1863_s21, %s1626_s29, %s2234_s24, %s2233_s19  }
  0x69   : > { %s194_s4 = sand.u32 (!%p1786_p6), 1, %s1596_s16   ;;  %p2235_p13 = scmp.ne.s32.totalorder (!%p1786_p6), %s2216_s28, 0 }
  0x6a   : > { %s1163_s15 = sshll.u32 (!%p1786_p6), %s194_s4, 9  ;;  %s195_s8 = scalar_lea.sflag (!%p1786_p6), [#allocation4], %s194_s4 }
  0x6b   : > { %s1896_s23 = scalar_lea.vmem (!%p1786_p6), [#allocation3], %s1163_s15 }
  0x6e   : > { %1555 = dma.done.wait (%p2235_p13), %s195_s8, 8192  }
  0x6f   : > { %1557 = vsyncadd (%p2235_p13), %s195_s8, 4294959104  ;;  %s203_s5 = sand.u32 1, %s1584_s13   ;;  %p2236_p6 = scmp.ne.s32.totalorder %s2223_s12, 0 }
  0x70   : > { %s1164_s25 = sshll.u32 %s203_s5, 9  ;;  %s204_s2 = scalar_lea.sflag [#allocation7], %s203_s5 }
  0x71   : > { %s1903_s6 = scalar_lea.vmem [#allocation6], %s1164_s25 }
  0x72   : > { %1559 = dma.done.wait (%p2236_p6), %s204_s2, 8192  }
  0x73   : > { %1561 = vsyncadd (%p2236_p6), %s204_s2, 4294959104  ;;  %v436_v0 = vld [vmem:[%s1903_s6 + $0x8] sm:$0xff]  ;;  %v438_v1 = vld [vmem:[%s1903_s6 + $0x18] sm:$0xff]  ;;  %s230_s28 = sand.u32 1, %s1572_s10   ;;  %s2237_s21 = sld [smem:[#allocation12_spill]] }
  0x74   : > { %v435_v2 = vld [vmem:[%s1903_s6] sm:$0xff]  ;;  %v1177_v3 = vpack.c.bf16 %v438_v1, %v436_v0  ;;  %v437_v4 = vld [vmem:[%s1903_s6 + $0x10] sm:$0xff]  ;;  %v440_v5 = vld [vmem:[%s1903_s6 + $0x28] sm:$0xff]  ;;  %s1165_s7 = sshll.u32 %s230_s28, 9  ;;  %s1168_s26 = sshll.u32 %s1604_s18, 1 }
  0x75   : > { %v442_v6 = vld [vmem:[%s1903_s6 + $0x38] sm:$0xff]  ;;  %v1179_v7 = vpack.c.bf16 %v437_v4, %v435_v2  ;;  %v439_v9 = vld [vmem:[%s1903_s6 + $0x20] sm:$0xff]  ;;  %v441_v10 = vld [vmem:[%s1903_s6 + $0x30] sm:$0xff]  ;;  %s2040_s12 = scalar_lea.vmem [#allocation8], %s1165_s7  ;;  %s2238_s24 = sld [smem:[#allocation17_spill]] }
  0x76   : > { %v1181_v8 = vpack.c.bf16 %v442_v6, %v440_v5  ;;  %v444_v11 = vld [vmem:[%s1903_s6 + $0x48] sm:$0xff]  ;;  %1178 = vmatprep.subr.bf16.mxu0 %v1177_v3  ;;  %1241 = vmatprep.subr.bf16.mxu1 %v1177_v3  ;;  %v446_v12 = vld [vmem:[%s1903_s6 + $0x58] sm:$0xff]  ;;  %v1183_v13 = vpack.c.bf16 %v441_v10, %v439_v9  ;;  %v443_v15 = vld [vmem:[%s1903_s6 + $0x40] sm:$0xff]  ;;  %s1032_s19 = sshll.u32 %s2040_s12, 4  ;;  %s2239_s8 = sld [smem:[#allocation19_spill]]  ;;  %s2110_s19 = int_to_ptr.vmem [resolvable:$true] %s1032_s19 }
  0x77   : > { %1180 = vmatpush1.bf16.msra.mxu0 %v1179_v7  ;;  %1257 = vmatpush1.bf16.msra.mxu1 %v1179_v7  ;;  %v1185_v14 = vpack.c.bf16 %v446_v12, %v444_v11  ;;  %v445_v16 = vld [vmem:[%s1903_s6 + $0x50] sm:$0xff]  ;;  %v448_v17 = vld [vmem:[%s1903_s6 + $0x68] sm:$0xff]  ;;  %v450_v18 = vld [vmem:[%s1903_s6 + $0x78] sm:$0xff]  ;;  %s2118_s5 = scalar_lea.sflag [#allocation5], %s230_s28  ;;  %s1470_s25 = scalar_lea.vmem %s2110_s19, 8192 }
  0x78   : > { %1182 = vmatprep.subr.bf16.mxu0 %v1181_v8  ;;  %1242 = vmatprep.subr.bf16.mxu1 %v1181_v8  ;;  %v1187_v19 = vpack.c.bf16 %v445_v16, %v443_v15  ;;  %v1189_v20 = vpack.c.bf16 %v450_v18, %v448_v17  ;;  %v447_v21 = vld [vmem:[%s1903_s6 + $0x60] sm:$0xff]  ;;  %v449_v22 = vld [vmem:[%s1903_s6 + $0x70] sm:$0xff]  ;;  %v452_v23 = vld [vmem:[%s1903_s6 + $0x88] sm:$0xff]  ;;  %p1471_p1 = scmp.ne.s32.totalorder %s2110_s19, %s1470_s25  ;;  %s1627_s2 = smov [#allocation8]  }
  0x79   : > { %v454_v24 = vld [vmem:[%s1903_s6 + $0x98] sm:$0xff]  ;;  %v1191_v25 = vpack.c.bf16 %v449_v22, %v447_v21  ;;  %v451_v27 = vld [vmem:[%s1903_s6 + $0x80] sm:$0xff]  ;;  %v453_v28 = vld [vmem:[%s1903_s6 + $0x90] sm:$0xff]  ;;  %s1176_s3 = sshll.u32 %s2237_s21, 8 }
  0x7a   : > { %v1193_v26 = vpack.c.bf16 %v454_v24, %v452_v23  ;;  %v456_v29 = vld [vmem:[%s1903_s6 + $0xa8] sm:$0xff]  ;;  %v458_v30 = vld [vmem:[%s1903_s6 + $0xb8] sm:$0xff]  ;;  %v1195_v31 = vpack.c.bf16 %v453_v28, %v451_v27  ;;  %v455_v33 = vld [vmem:[%s1903_s6 + $0xa0] sm:$0xff]  ;;  %s1029_s29 = sadd.s32 %s1176_s3, %s1168_s26 }
  0x7b   : > { %1184 = vmatpush1.bf16.msra.mxu0 %v1183_v13  ;;  %1258 = vmatpush1.bf16.msra.mxu1 %v1183_v13  ;;  %v1197_v32 = vpack.c.bf16 %v458_v30, %v456_v29  ;;  %v457_v34 = vld [vmem:[%s1903_s6 + $0xb0] sm:$0xff]  ;;  %v460_v35 = vld [vmem:[%s1903_s6 + $0xc8] sm:$0xff]  ;;  %v462_v36 = vld [vmem:[%s1903_s6 + $0xd8] sm:$0xff]  ;;  %s1170_s18 = sshll.u32 %s1029_s29, 7  ;;  %p2240_p12 = scmp.ne.s32.totalorder %s2238_s24, 0 }
  0x7c   : > { %1186 = vmatprep.subr.bf16.mxu0 %v1185_v14  ;;  %1243 = vmatprep.subr.bf16.mxu1 %v1185_v14  ;;  %v1199_v37 = vpack.c.bf16 %v457_v34, %v455_v33  ;;  %v459_v38 = vld [vmem:[%s1903_s6 + $0xc0] sm:$0xff]  ;;  %v1201_v39 = vpack.c.bf16 %v462_v36, %v460_v35  ;;  %v461_v40 = vld [vmem:[%s1903_s6 + $0xd0] sm:$0xff]  ;;  %v372_v41 = vld [vmem:[%s1896_s23 + $0x8] sm:$0xff] }
  0x7d   : > { %v404_v42 = vld [vmem:[%s1896_s23 + $0x108] sm:$0xff]  ;;  %v466_v44 = vld [vmem:[%s1903_s6 + $0xf8] sm:$0xff]  ;;  %563 = vmatprep.mubr.f32.mxu0 %v372_v41  ;;  %v1203_v45 = vpack.c.bf16 %v461_v40, %v459_v38  ;;  %v463_v47 = vld [vmem:[%s1903_s6 + $0xe0] sm:$0xff]  ;;  %p1472_p9 = pnand %p1471_p1, %p2240_p12 }
  0x7e   : > { %v464_v43 = vld [vmem:[%s1903_s6 + $0xe8] sm:$0xff]  ;;  %659 = vmatprep.mubr.f32.mxu1 %v404_v42  ;;  %v465_v48 = vld [vmem:[%s1903_s6 + $0xf0] sm:$0xff]  ;;  %v470_v50 = vld [vmem:[%s1903_s6 + $0x118] sm:$0xff] }
  0x7f   : > { %1188 = vmatpush1.bf16.msra.mxu0 %v1187_v19  ;;  %1259 = vmatpush1.bf16.msra.mxu1 %v1187_v19  ;;  %v1205_v46 = vpack.c.bf16 %v466_v44, %v464_v43  ;;  %v468_v49 = vld [vmem:[%s1903_s6 + $0x108] sm:$0xff]  ;;  %v1207_v51 = vpack.c.bf16 %v465_v48, %v463_v47  ;;  %v467_v53 = vld [vmem:[%s1903_s6 + $0x100] sm:$0xff]  ;;  %v469_v54 = vld [vmem:[%s1903_s6 + $0x110] sm:$0xff]  ;;  %p1473_p0 = pneg %p1472_p9 }
  0x80   : > { %1190 = vmatprep.subr.bf16.mxu0 %v1189_v20  ;;  %1244 = vmatprep.subr.bf16.mxu1 %v1189_v20  ;;  %v1209_v52 = vpack.c.bf16 %v470_v50, %v468_v49  ;;  %v472_v55 = vld [vmem:[%s1903_s6 + $0x128] sm:$0xff]  ;;  %v474_v56 = vld [vmem:[%s1903_s6 + $0x138] sm:$0xff]  ;;  %v1211_v57 = vpack.c.bf16 %v469_v54, %v467_v53  ;;  %v471_v59 = vld [vmem:[%s1903_s6 + $0x120] sm:$0xff] }
  0x81   : > { %v1213_v58 = vpack.c.bf16 %v474_v56, %v472_v55  ;;  %v473_v60 = vld [vmem:[%s1903_s6 + $0x130] sm:$0xff]  ;;  %v476_v61 = vld [vmem:[%s1903_s6 + $0x148] sm:$0xff]  ;;  %v478_v62 = vld [vmem:[%s1903_s6 + $0x158] sm:$0xff] }
  0x82   : > { %v1215_v63 = vpack.c.bf16 %v473_v60, %v471_v59  ;;  %v1217_v0 = vpack.c.bf16 %v478_v62, %v476_v61  ;;  %v475_v1 = vld [vmem:[%s1903_s6 + $0x140] sm:$0xff]  ;;  %v477_v2 = vld [vmem:[%s1903_s6 + $0x150] sm:$0xff]  ;;  %v480_v3 = vld [vmem:[%s1903_s6 + $0x168] sm:$0xff] }
  0x83   : > { %1192 = vmatpush1.bf16.msra.mxu0 %v1191_v25  ;;  %1260 = vmatpush1.bf16.msra.mxu1 %v1191_v25  ;;  %v482_v4 = vld [vmem:[%s1903_s6 + $0x178] sm:$0xff]  ;;  %v1219_v5 = vpack.c.bf16 %v477_v2, %v475_v1  ;;  %v479_v7 = vld [vmem:[%s1903_s6 + $0x160] sm:$0xff]  ;;  %v481_v8 = vld [vmem:[%s1903_s6 + $0x170] sm:$0xff] }
  0x84   : > { %1194 = vmatprep.subr.bf16.mxu0 %v1193_v26  ;;  %1245 = vmatprep.subr.bf16.mxu1 %v1193_v26  ;;  %v1221_v6 = vpack.c.bf16 %v482_v4, %v480_v3  ;;  %v484_v9 = vld [vmem:[%s1903_s6 + $0x188] sm:$0xff]  ;;  %v486_v10 = vld [vmem:[%s1903_s6 + $0x198] sm:$0xff]  ;;  %v1223_v11 = vpack.c.bf16 %v481_v8, %v479_v7  ;;  %v483_v13 = vld [vmem:[%s1903_s6 + $0x180] sm:$0xff] }
  0x85   : > { %v1225_v12 = vpack.c.bf16 %v486_v10, %v484_v9  ;;  %v485_v14 = vld [vmem:[%s1903_s6 + $0x190] sm:$0xff]  ;;  %v488_v15 = vld [vmem:[%s1903_s6 + $0x1a8] sm:$0xff]  ;;  %v490_v16 = vld [vmem:[%s1903_s6 + $0x1b8] sm:$0xff] }
  0x86   : > { %v1227_v17 = vpack.c.bf16 %v485_v14, %v483_v13  ;;  %v1229_v18 = vpack.c.bf16 %v490_v16, %v488_v15  ;;  %v487_v19 = vld [vmem:[%s1903_s6 + $0x1a0] sm:$0xff]  ;;  %v489_v20 = vld [vmem:[%s1903_s6 + $0x1b0] sm:$0xff]  ;;  %v492_v21 = vld [vmem:[%s1903_s6 + $0x1c8] sm:$0xff] }
  0x87   : > { %1196 = vmatpush1.bf16.msra.mxu0 %v1195_v31  ;;  %1261 = vmatpush1.bf16.msra.mxu1 %v1195_v31  ;;  %v494_v22 = vld [vmem:[%s1903_s6 + $0x1d8] sm:$0xff]  ;;  %v1231_v23 = vpack.c.bf16 %v489_v20, %v487_v19  ;;  %v491_v25 = vld [vmem:[%s1903_s6 + $0x1c0] sm:$0xff]  ;;  %v493_v26 = vld [vmem:[%s1903_s6 + $0x1d0] sm:$0xff] }
  0x88   : > { %1198 = vmatprep.subr.bf16.mxu0 %v1197_v32  ;;  %1246 = vmatprep.subr.bf16.mxu1 %v1197_v32  ;;  %v1233_v24 = vpack.c.bf16 %v494_v22, %v492_v21  ;;  %v496_v27 = vld [vmem:[%s1903_s6 + $0x1e8] sm:$0xff]  ;;  %v498_v28 = vld [vmem:[%s1903_s6 + $0x1f8] sm:$0xff]  ;;  %v1235_v29 = vpack.c.bf16 %v493_v26, %v491_v25  ;;  %v495_v31 = vld [vmem:[%s1903_s6 + $0x1e0] sm:$0xff] }
  0x89   : > { %v1237_v30 = vpack.c.bf16 %v498_v28, %v496_v27  ;;  %v497_v32 = vld [vmem:[%s1903_s6 + $0x1f0] sm:$0xff]  ;;  %v371_v34 = vld [vmem:[%s1896_s23] sm:$0xff]  ;;  %v374_v36 = vld [vmem:[%s1896_s23 + $0x18] sm:$0xff]  ;;  %s1474_s6 = sshll.u32 %s1627_s2, 4  ;;  %s1475_s6 = int_to_ptr.vmem [resolvable:$false] %s1474_s6 }
  0x8a   : > { %v1239_v33 = vpack.c.bf16 %v497_v32, %v495_v31  ;;  %v403_v35 = vld [vmem:[%s1896_s23 + $0x100] sm:$0xff]  ;;  %v373_v38 = vld [vmem:[%s1896_s23 + $0x10] sm:$0xff]  ;;  %v376_v40 = vld [vmem:[%s1896_s23 + $0x28] sm:$0xff]  ;;  %s1476_s7 = scalar_lea.vmem %s1475_s6, 16384  ;;  %p1477_p4 = scmp.lt.s32.totalorder %s2110_s19, %s1475_s6 }
  0x8b   : > { %1200 = vmatpush1.bf16.msra.mxu0 %v1199_v37  ;;  %1262 = vmatpush1.bf16.msra.mxu1 %v1199_v37  ;;  %v406_v37 = vld [vmem:[%s1896_s23 + $0x118] sm:$0xff]  ;;  %v408_v41 = vld [vmem:[%s1896_s23 + $0x128] sm:$0xff]  ;;  %v375_v42 = vld [vmem:[%s1896_s23 + $0x20] sm:$0xff]  ;;  %p1478_p10 = scmp.lt.s32.totalorder %s1476_s7, %s1470_s25 }
  0x8c   : > { %1202 = vmatprep.subr.bf16.mxu0 %v1201_v39  ;;  %1247 = vmatprep.subr.bf16.mxu1 %v1201_v39  ;;  %v405_v39 = vld [vmem:[%s1896_s23 + $0x110] sm:$0xff]  ;;  %v407_v43 = vld [vmem:[%s1896_s23 + $0x120] sm:$0xff]  ;;  %v378_v44 = vld [vmem:[%s1896_s23 + $0x38] sm:$0xff] }
  0x8d   : > { %v409_v47 = vld [vmem:[%s1896_s23 + $0x130] sm:$0xff]  ;;  %v380_v48 = vld [vmem:[%s1896_s23 + $0x48] sm:$0xff]  ;;  %v379_v50 = vld [vmem:[%s1896_s23 + $0x40] sm:$0xff]  ;;  %p1479_p8 = por %p1478_p10, %p1477_p4 }
  0x8e   : > { %v412_v49 = vld [vmem:[%s1896_s23 + $0x148] sm:$0xff]  ;;  %v414_v53 = vld [vmem:[%s1896_s23 + $0x158] sm:$0xff]  ;;  %v381_v54 = vld [vmem:[%s1896_s23 + $0x50] sm:$0xff] }
  0x8f   : > { %1204 = vmatpush1.bf16.msra.mxu0 %v1203_v45  ;;  %1263 = vmatpush1.bf16.msra.mxu1 %v1203_v45  ;;  %v410_v45 = vld [vmem:[%s1896_s23 + $0x138] sm:$0xff]  ;;  %v413_v55 = vld [vmem:[%s1896_s23 + $0x150] sm:$0xff]  ;;  %v384_v56 = vld [vmem:[%s1896_s23 + $0x68] sm:$0xff]  ;;  %p1480_p11 = pnand %p1479_p8, %p1473_p0 }
  0x90   : > { %1206 = vmatprep.subr.bf16.mxu0 %v1205_v46  ;;  %1248 = vmatprep.subr.bf16.mxu1 %v1205_v46  ;;  %v377_v46 = vld [vmem:[%s1896_s23 + $0x30] sm:$0xff]  ;;  %v415_v59 = vld [vmem:[%s1896_s23 + $0x160] sm:$0xff]  ;;  %v386_v60 = vld [vmem:[%s1896_s23 + $0x78] sm:$0xff] }
  0x91   : > { %v418_v61 = vld [vmem:[%s1896_s23 + $0x178] sm:$0xff]  ;;  %v385_v62 = vld [vmem:[%s1896_s23 + $0x70] sm:$0xff]  ;;  %v420_v1 = vld [vmem:[%s1896_s23 + $0x188] sm:$0xff] }
  0x92   : > { %v387_v2 = vld [vmem:[%s1896_s23 + $0x80] sm:$0xff]  ;;  %v390_v4 = vld [vmem:[%s1896_s23 + $0x98] sm:$0xff]  ;;  %v421_v7 = vld [vmem:[%s1896_s23 + $0x190] sm:$0xff] }
  0x93   : > { %1208 = vmatpush1.bf16.msra.mxu0 %v1207_v51  ;;  %1264 = vmatpush1.bf16.msra.mxu1 %v1207_v51  ;;  %v411_v51 = vld [vmem:[%s1896_s23 + $0x140] sm:$0xff]  ;;  %v392_v8 = vld [vmem:[%s1896_s23 + $0xa8] sm:$0xff]  ;;  %v426_v13 = vld [vmem:[%s1896_s23 + $0x1b8] sm:$0xff] }
  0x94   : > { %1210 = vmatprep.subr.bf16.mxu0 %v1209_v52  ;;  %1249 = vmatprep.subr.bf16.mxu1 %v1209_v52  ;;  %v382_v52 = vld [vmem:[%s1896_s23 + $0x58] sm:$0xff]  ;;  %v419_v3 = vld [vmem:[%s1896_s23 + $0x180] sm:$0xff]  ;;  %v424_v9 = vld [vmem:[%s1896_s23 + $0x1a8] sm:$0xff] }
  0x95   : > { %v391_v10 = vld [vmem:[%s1896_s23 + $0xa0] sm:$0xff]  ;;  %v393_v14 = vld [vmem:[%s1896_s23 + $0xb0] sm:$0xff]  ;;  %v396_v16 = vld [vmem:[%s1896_s23 + $0xc8] sm:$0xff] }
  0x96   : > { %v425_v15 = vld [vmem:[%s1896_s23 + $0x1b0] sm:$0xff]  ;;  %v427_v19 = vld [vmem:[%s1896_s23 + $0x1c0] sm:$0xff]  ;;  %v398_v20 = vld [vmem:[%s1896_s23 + $0xd8] sm:$0xff] }
  0x97   : > { %1212 = vmatpush1.bf16.msra.mxu0 %v1211_v57  ;;  %1265 = vmatpush1.bf16.msra.mxu1 %v1211_v57  ;;  %v416_v57 = vld [vmem:[%s1896_s23 + $0x168] sm:$0xff]  ;;  %v430_v21 = vld [vmem:[%s1896_s23 + $0x1d8] sm:$0xff]  ;;  %v397_v22 = vld [vmem:[%s1896_s23 + $0xd0] sm:$0xff] }
  0x98   : > { %1214 = vmatprep.subr.bf16.mxu0 %v1213_v58  ;;  %1250 = vmatprep.subr.bf16.mxu1 %v1213_v58  ;;  %v383_v58 = vld [vmem:[%s1896_s23 + $0x60] sm:$0xff]  ;;  %v432_v25 = vld [vmem:[%s1896_s23 + $0x1e8] sm:$0xff]  ;;  %v402_v28 = vld [vmem:[%s1896_s23 + $0xf8] sm:$0xff] }
  0x99   : > { %v399_v26 = vld [vmem:[%s1896_s23 + $0xe0] sm:$0xff]  ;;  %v433_v31 = vld [vmem:[%s1896_s23 + $0x1f0] sm:$0xff] }
  0x9a   : > { %v431_v27 = vld [vmem:[%s1896_s23 + $0x1e0] sm:$0xff] }
  0x9b   : > { %1216 = vmatpush1.bf16.msra.mxu0 %v1215_v63  ;;  %1266 = vmatpush1.bf16.msra.mxu1 %v1215_v63  ;;  %v417_v63 = vld [vmem:[%s1896_s23 + $0x170] sm:$0xff] }
  0x9c   : > { %1218 = vmatprep.subr.bf16.mxu0 %v1217_v0  ;;  %1251 = vmatprep.subr.bf16.mxu1 %v1217_v0  ;;  %v388_v0 = vld [vmem:[%s1896_s23 + $0x88] sm:$0xff] }
  0x9f   : > { %1220 = vmatpush1.bf16.msra.mxu0 %v1219_v5  ;;  %1267 = vmatpush1.bf16.msra.mxu1 %v1219_v5  ;;  %v422_v5 = vld [vmem:[%s1896_s23 + $0x198] sm:$0xff] }
  0xa0   : > { %1222 = vmatprep.subr.bf16.mxu0 %v1221_v6  ;;  %1252 = vmatprep.subr.bf16.mxu1 %v1221_v6  ;;  %v389_v6 = vld [vmem:[%s1896_s23 + $0x90] sm:$0xff] }
  0xa3   : > { %1224 = vmatpush1.bf16.msra.mxu0 %v1223_v11  ;;  %1268 = vmatpush1.bf16.msra.mxu1 %v1223_v11  ;;  %v423_v11 = vld [vmem:[%s1896_s23 + $0x1a0] sm:$0xff] }
  0xa4   : > { %1226 = vmatprep.subr.bf16.mxu0 %v1225_v12  ;;  %1253 = vmatprep.subr.bf16.mxu1 %v1225_v12  ;;  %v394_v12 = vld [vmem:[%s1896_s23 + $0xb8] sm:$0xff] }
  0xa7   : > { %1228 = vmatpush1.bf16.msra.mxu0 %v1227_v17  ;;  %1269 = vmatpush1.bf16.msra.mxu1 %v1227_v17  ;;  %v428_v17 = vld [vmem:[%s1896_s23 + $0x1c8] sm:$0xff] }
  0xa8   : > { %1230 = vmatprep.subr.bf16.mxu0 %v1229_v18  ;;  %1254 = vmatprep.subr.bf16.mxu1 %v1229_v18  ;;  %v395_v18 = vld [vmem:[%s1896_s23 + $0xc0] sm:$0xff] }
  0xab   : > { %1232 = vmatpush1.bf16.msra.mxu0 %v1231_v23  ;;  %1270 = vmatpush1.bf16.msra.mxu1 %v1231_v23  ;;  %v429_v23 = vld [vmem:[%s1896_s23 + $0x1d0] sm:$0xff] }
  0xac   : > { %1234 = vmatprep.subr.bf16.mxu0 %v1233_v24  ;;  %1255 = vmatprep.subr.bf16.mxu1 %v1233_v24  ;;  %v400_v24 = vld [vmem:[%s1896_s23 + $0xe8] sm:$0xff] }
  0xaf   : > { %1236 = vmatpush1.bf16.msra.mxu0 %v1235_v29  ;;  %1271 = vmatpush1.bf16.msra.mxu1 %v1235_v29  ;;  %v434_v29 = vld [vmem:[%s1896_s23 + $0x1f8] sm:$0xff] }
  0xb0   : > { %1238 = vmatprep.subr.bf16.mxu0 %v1237_v30  ;;  %1256 = vmatprep.subr.bf16.mxu1 %v1237_v30  ;;  %v401_v30 = vld [vmem:[%s1896_s23 + $0xf0] sm:$0xff]  ;;  %s2108_s23 = scalar_lea.hbm %s2239_s8, %s1170_s18 }
  0xb3   : > { %1240 = vmatpush1.bf16.msra.mxu0 %v1239_v33  ;;  %1272 = vmatpush1.bf16.msra.mxu1 %v1239_v33 }
  0xb6   : > { %564 = vmatmul.mubr.f32.vlgmr.msra.gmra.mrb[0].mxu0 %v371_v34  ;;  %660 = vmatmul.mubr.f32.vlgmr.msra.gmra.mrb[0].mxu1 %v403_v35 }
  0xb7   : > { %569 = vmatprep.mubr.f32.mxu0 %v374_v36  ;;  %665 = vmatprep.mubr.f32.mxu1 %v406_v37 }
  0xba   : > { %570 = vmatmul.mubr.f32.gmra.mrb[2].mxu0 %v373_v38  ;;  %666 = vmatmul.mubr.f32.gmra.mrb[2].mxu1 %v405_v39 }
  0xbb   : > { %575 = vmatprep.mubr.f32.mxu0 %v376_v40  ;;  %671 = vmatprep.mubr.f32.mxu1 %v408_v41 }
  0xbe   : > { %576 = vmatmul.mubr.f32.gmra.mrb[4].mxu0 %v375_v42  ;;  %672 = vmatmul.mubr.f32.gmra.mrb[4].mxu1 %v407_v43 }
  0xbf   : > { %581 = vmatprep.mubr.f32.mxu0 %v378_v44  ;;  %677 = vmatprep.mubr.f32.mxu1 %v410_v45 }
  0xc2   : > { %582 = vmatmul.mubr.f32.gmra.mrb[6].mxu0 %v377_v46  ;;  %678 = vmatmul.mubr.f32.gmra.mrb[6].mxu1 %v409_v47 }
  0xc3   : > { %587 = vmatprep.mubr.f32.mxu0 %v380_v48  ;;  %683 = vmatprep.mubr.f32.mxu1 %v412_v49 }
  0xc6   : > { %588 = vmatmul.mubr.f32.gmra.mrb[8].mxu0 %v379_v50  ;;  %684 = vmatmul.mubr.f32.gmra.mrb[8].mxu1 %v411_v51 }
  0xc7   : > { %593 = vmatprep.mubr.f32.mxu0 %v382_v52  ;;  %689 = vmatprep.mubr.f32.mxu1 %v414_v53 }
  0xca   : > { %594 = vmatmul.mubr.f32.gmra.mrb[10].mxu0 %v381_v54  ;;  %690 = vmatmul.mubr.f32.gmra.mrb[10].mxu1 %v413_v55 }
  0xcb   : > { %599 = vmatprep.mubr.f32.mxu0 %v384_v56  ;;  %695 = vmatprep.mubr.f32.mxu1 %v416_v57 }
  0xce   : > { %600 = vmatmul.mubr.f32.gmra.mrb[12].mxu0 %v383_v58  ;;  %696 = vmatmul.mubr.f32.gmra.mrb[12].mxu1 %v415_v59 }
  0xcf   : > { %605 = vmatprep.mubr.f32.mxu0 %v386_v60  ;;  %701 = vmatprep.mubr.f32.mxu1 %v418_v61 }
  0xd2   : > { %606 = vmatmul.mubr.f32.gmra.mrb[14].mxu0 %v385_v62  ;;  %702 = vmatmul.mubr.f32.gmra.mrb[14].mxu1 %v417_v63 }
  0xd3   : > { %611 = vmatprep.mubr.f32.mxu0 %v388_v0  ;;  %707 = vmatprep.mubr.f32.mxu1 %v420_v1 }
  0xd6   : > { %612 = vmatmul.mubr.f32.gmra.mrb[16].mxu0 %v387_v2  ;;  %708 = vmatmul.mubr.f32.gmra.mrb[16].mxu1 %v419_v3 }
  0xd7   : > { %617 = vmatprep.mubr.f32.mxu0 %v390_v4  ;;  %713 = vmatprep.mubr.f32.mxu1 %v422_v5 }
  0xda   : > { %618 = vmatmul.mubr.f32.gmra.mrb[18].mxu0 %v389_v6  ;;  %714 = vmatmul.mubr.f32.gmra.mrb[18].mxu1 %v421_v7 }
  0xdb   : > { %623 = vmatprep.mubr.f32.mxu0 %v392_v8  ;;  %719 = vmatprep.mubr.f32.mxu1 %v424_v9 }
  0xde   : > { %624 = vmatmul.mubr.f32.gmra.mrb[20].mxu0 %v391_v10  ;;  %720 = vmatmul.mubr.f32.gmra.mrb[20].mxu1 %v423_v11 }
  0xdf   : > { %629 = vmatprep.mubr.f32.mxu0 %v394_v12  ;;  %725 = vmatprep.mubr.f32.mxu1 %v426_v13 }
  0xe2   : > { %630 = vmatmul.mubr.f32.gmra.mrb[22].mxu0 %v393_v14  ;;  %726 = vmatmul.mubr.f32.gmra.mrb[22].mxu1 %v425_v15 }
  0xe3   : > { %635 = vmatprep.mubr.f32.mxu0 %v396_v16  ;;  %731 = vmatprep.mubr.f32.mxu1 %v428_v17 }
  0xe6   : > { %636 = vmatmul.mubr.f32.gmra.mrb[24].mxu0 %v395_v18  ;;  %732 = vmatmul.mubr.f32.gmra.mrb[24].mxu1 %v427_v19 }
  0xe7   : > { %641 = vmatprep.mubr.f32.mxu0 %v398_v20  ;;  %737 = vmatprep.mubr.f32.mxu1 %v430_v21 }
  0xea   : > { %642 = vmatmul.mubr.f32.gmra.mrb[26].mxu0 %v397_v22  ;;  %738 = vmatmul.mubr.f32.gmra.mrb[26].mxu1 %v429_v23 }
  0xeb   : > { %647 = vmatprep.mubr.f32.mxu0 %v400_v24  ;;  %743 = vmatprep.mubr.f32.mxu1 %v432_v25 }
  0xee   : > { %648 = vmatmul.mubr.f32.gmra.mrb[28].mxu0 %v399_v26  ;;  %744 = vmatmul.mubr.f32.gmra.mrb[28].mxu1 %v431_v27 }
  0xef   : > { %653 = vmatprep.mubr.f32.mxu0 %v402_v28  ;;  %749 = vmatprep.mubr.f32.mxu1 %v434_v29 }
  0xf2   : > { %654 = vmatmul.mubr.f32.gmra.mrb[30].mxu0 %v401_v30  ;;  %750 = vmatmul.mubr.f32.gmra.mrb[30].mxu1 %v433_v31 }
 0x189   : > { %v565_v32 = vpop.f32.mrb[0].mxu0  ;;  %v661_v33 = vpop.f32.mrb[0].mxu1 }
 0x18a   : > { %951 = vst [vmem:[%s2040_s12] sm:$0xff] %v565_v32  ;;  %983 = vst [vmem:[%s2040_s12 + $0x100] sm:$0xff] %v661_v33  ;;  %v567_v34 = vpop.f32.mrb[1].mxu0  ;;  %v663_v35 = vpop.f32.mrb[1].mxu1 }
 0x18b   : > { %952 = vst [vmem:[%s2040_s12 + $0x8] sm:$0xff] %v567_v34  ;;  %984 = vst [vmem:[%s2040_s12 + $0x108] sm:$0xff] %v663_v35 }
 0x18d   : > { %v571_v36 = vpop.f32.mrb[2].mxu0  ;;  %v667_v37 = vpop.f32.mrb[2].mxu1 }
 0x18e   : > { %953 = vst [vmem:[%s2040_s12 + $0x10] sm:$0xff] %v571_v36  ;;  %985 = vst [vmem:[%s2040_s12 + $0x110] sm:$0xff] %v667_v37  ;;  %v573_v38 = vpop.f32.mrb[3].mxu0  ;;  %v669_v39 = vpop.f32.mrb[3].mxu1 }
 0x18f   : > { %954 = vst [vmem:[%s2040_s12 + $0x18] sm:$0xff] %v573_v38  ;;  %986 = vst [vmem:[%s2040_s12 + $0x118] sm:$0xff] %v669_v39 }
 0x191   : > { %v577_v40 = vpop.f32.mrb[4].mxu0  ;;  %v673_v41 = vpop.f32.mrb[4].mxu1 }
 0x192   : > { %955 = vst [vmem:[%s2040_s12 + $0x20] sm:$0xff] %v577_v40  ;;  %987 = vst [vmem:[%s2040_s12 + $0x120] sm:$0xff] %v673_v41  ;;  %v579_v42 = vpop.f32.mrb[5].mxu0  ;;  %v675_v43 = vpop.f32.mrb[5].mxu1 }
 0x193   : > { %956 = vst [vmem:[%s2040_s12 + $0x28] sm:$0xff] %v579_v42  ;;  %988 = vst [vmem:[%s2040_s12 + $0x128] sm:$0xff] %v675_v43 }
 0x195   : > { %v583_v44 = vpop.f32.mrb[6].mxu0  ;;  %v679_v45 = vpop.f32.mrb[6].mxu1 }
 0x196   : > { %957 = vst [vmem:[%s2040_s12 + $0x30] sm:$0xff] %v583_v44  ;;  %989 = vst [vmem:[%s2040_s12 + $0x130] sm:$0xff] %v679_v45  ;;  %v585_v46 = vpop.f32.mrb[7].mxu0  ;;  %v681_v47 = vpop.f32.mrb[7].mxu1 }
 0x197   : > { %958 = vst [vmem:[%s2040_s12 + $0x38] sm:$0xff] %v585_v46  ;;  %990 = vst [vmem:[%s2040_s12 + $0x138] sm:$0xff] %v681_v47 }
 0x199   : > { %v589_v48 = vpop.f32.mrb[8].mxu0  ;;  %v685_v49 = vpop.f32.mrb[8].mxu1 }
 0x19a   : > { %959 = vst [vmem:[%s2040_s12 + $0x40] sm:$0xff] %v589_v48  ;;  %991 = vst [vmem:[%s2040_s12 + $0x140] sm:$0xff] %v685_v49  ;;  %v591_v50 = vpop.f32.mrb[9].mxu0  ;;  %v687_v51 = vpop.f32.mrb[9].mxu1 }
 0x19b   : > { %960 = vst [vmem:[%s2040_s12 + $0x48] sm:$0xff] %v591_v50  ;;  %992 = vst [vmem:[%s2040_s12 + $0x148] sm:$0xff] %v687_v51 }
 0x19d   : > { %v595_v52 = vpop.f32.mrb[10].mxu0  ;;  %v691_v53 = vpop.f32.mrb[10].mxu1 }
 0x19e   : > { %961 = vst [vmem:[%s2040_s12 + $0x50] sm:$0xff] %v595_v52  ;;  %993 = vst [vmem:[%s2040_s12 + $0x150] sm:$0xff] %v691_v53  ;;  %v597_v54 = vpop.f32.mrb[11].mxu0  ;;  %v693_v55 = vpop.f32.mrb[11].mxu1 }
 0x19f   : > { %962 = vst [vmem:[%s2040_s12 + $0x58] sm:$0xff] %v597_v54  ;;  %994 = vst [vmem:[%s2040_s12 + $0x158] sm:$0xff] %v693_v55 }
 0x1a1   : > { %v601_v56 = vpop.f32.mrb[12].mxu0  ;;  %v697_v57 = vpop.f32.mrb[12].mxu1 }
 0x1a2   : > { %963 = vst [vmem:[%s2040_s12 + $0x60] sm:$0xff] %v601_v56  ;;  %995 = vst [vmem:[%s2040_s12 + $0x160] sm:$0xff] %v697_v57  ;;  %v603_v58 = vpop.f32.mrb[13].mxu0  ;;  %v699_v59 = vpop.f32.mrb[13].mxu1 }
 0x1a3   : > { %964 = vst [vmem:[%s2040_s12 + $0x68] sm:$0xff] %v603_v58  ;;  %996 = vst [vmem:[%s2040_s12 + $0x168] sm:$0xff] %v699_v59 }
 0x1a5   : > { %v607_v60 = vpop.f32.mrb[14].mxu0  ;;  %v703_v61 = vpop.f32.mrb[14].mxu1 }
 0x1a6   : > { %965 = vst [vmem:[%s2040_s12 + $0x70] sm:$0xff] %v607_v60  ;;  %997 = vst [vmem:[%s2040_s12 + $0x170] sm:$0xff] %v703_v61  ;;  %v609_v62 = vpop.f32.mrb[15].mxu0  ;;  %v705_v63 = vpop.f32.mrb[15].mxu1 }
 0x1a7   : > { %966 = vst [vmem:[%s2040_s12 + $0x78] sm:$0xff] %v609_v62  ;;  %998 = vst [vmem:[%s2040_s12 + $0x178] sm:$0xff] %v705_v63 }
 0x1a9   : > { %v613_v0 = vpop.f32.mrb[16].mxu0  ;;  %v709_v1 = vpop.f32.mrb[16].mxu1 }
 0x1aa   : > { %967 = vst [vmem:[%s2040_s12 + $0x80] sm:$0xff] %v613_v0  ;;  %999 = vst [vmem:[%s2040_s12 + $0x180] sm:$0xff] %v709_v1  ;;  %v615_v2 = vpop.f32.mrb[17].mxu0  ;;  %v711_v3 = vpop.f32.mrb[17].mxu1 }
 0x1ab   : > { %968 = vst [vmem:[%s2040_s12 + $0x88] sm:$0xff] %v615_v2  ;;  %1000 = vst [vmem:[%s2040_s12 + $0x188] sm:$0xff] %v711_v3 }
 0x1ad   : > { %v619_v4 = vpop.f32.mrb[18].mxu0  ;;  %v715_v5 = vpop.f32.mrb[18].mxu1 }
 0x1ae   : > { %969 = vst [vmem:[%s2040_s12 + $0x90] sm:$0xff] %v619_v4  ;;  %1001 = vst [vmem:[%s2040_s12 + $0x190] sm:$0xff] %v715_v5  ;;  %v621_v6 = vpop.f32.mrb[19].mxu0  ;;  %v717_v7 = vpop.f32.mrb[19].mxu1 }
 0x1af   : > { %970 = vst [vmem:[%s2040_s12 + $0x98] sm:$0xff] %v621_v6  ;;  %1002 = vst [vmem:[%s2040_s12 + $0x198] sm:$0xff] %v717_v7 }
 0x1b1   : > { %v625_v8 = vpop.f32.mrb[20].mxu0  ;;  %v721_v9 = vpop.f32.mrb[20].mxu1 }
 0x1b2   : > { %971 = vst [vmem:[%s2040_s12 + $0xa0] sm:$0xff] %v625_v8  ;;  %1003 = vst [vmem:[%s2040_s12 + $0x1a0] sm:$0xff] %v721_v9  ;;  %v627_v10 = vpop.f32.mrb[21].mxu0  ;;  %v723_v11 = vpop.f32.mrb[21].mxu1 }
 0x1b3   : > { %972 = vst [vmem:[%s2040_s12 + $0xa8] sm:$0xff] %v627_v10  ;;  %1004 = vst [vmem:[%s2040_s12 + $0x1a8] sm:$0xff] %v723_v11 }
 0x1b5   : > { %v631_v12 = vpop.f32.mrb[22].mxu0  ;;  %v727_v13 = vpop.f32.mrb[22].mxu1 }
 0x1b6   : > { %973 = vst [vmem:[%s2040_s12 + $0xb0] sm:$0xff] %v631_v12  ;;  %1005 = vst [vmem:[%s2040_s12 + $0x1b0] sm:$0xff] %v727_v13  ;;  %v633_v14 = vpop.f32.mrb[23].mxu0  ;;  %v729_v15 = vpop.f32.mrb[23].mxu1 }
 0x1b7   : > { %974 = vst [vmem:[%s2040_s12 + $0xb8] sm:$0xff] %v633_v14  ;;  %1006 = vst [vmem:[%s2040_s12 + $0x1b8] sm:$0xff] %v729_v15 }
 0x1b9   : > { %v637_v16 = vpop.f32.mrb[24].mxu0  ;;  %v733_v17 = vpop.f32.mrb[24].mxu1 }
 0x1ba   : > { %975 = vst [vmem:[%s2040_s12 + $0xc0] sm:$0xff] %v637_v16  ;;  %1007 = vst [vmem:[%s2040_s12 + $0x1c0] sm:$0xff] %v733_v17  ;;  %v639_v18 = vpop.f32.mrb[25].mxu0  ;;  %v735_v19 = vpop.f32.mrb[25].mxu1 }
 0x1bb   : > { %976 = vst [vmem:[%s2040_s12 + $0xc8] sm:$0xff] %v639_v18  ;;  %1008 = vst [vmem:[%s2040_s12 + $0x1c8] sm:$0xff] %v735_v19 }
 0x1bd   : > { %v643_v20 = vpop.f32.mrb[26].mxu0  ;;  %v739_v21 = vpop.f32.mrb[26].mxu1 }
 0x1be   : > { %977 = vst [vmem:[%s2040_s12 + $0xd0] sm:$0xff] %v643_v20  ;;  %1009 = vst [vmem:[%s2040_s12 + $0x1d0] sm:$0xff] %v739_v21  ;;  %v645_v22 = vpop.f32.mrb[27].mxu0  ;;  %v741_v23 = vpop.f32.mrb[27].mxu1 }
 0x1bf   : > { %978 = vst [vmem:[%s2040_s12 + $0xd8] sm:$0xff] %v645_v22  ;;  %1010 = vst [vmem:[%s2040_s12 + $0x1d8] sm:$0xff] %v741_v23 }
 0x1c1   : > { %v649_v24 = vpop.f32.mrb[28].mxu0  ;;  %v745_v25 = vpop.f32.mrb[28].mxu1 }
 0x1c2   : > { %979 = vst [vmem:[%s2040_s12 + $0xe0] sm:$0xff] %v649_v24  ;;  %1011 = vst [vmem:[%s2040_s12 + $0x1e0] sm:$0xff] %v745_v25  ;;  %v651_v26 = vpop.f32.mrb[29].mxu0  ;;  %v747_v27 = vpop.f32.mrb[29].mxu1 }
 0x1c3   : > { %980 = vst [vmem:[%s2040_s12 + $0xe8] sm:$0xff] %v651_v26  ;;  %1012 = vst [vmem:[%s2040_s12 + $0x1e8] sm:$0xff] %v747_v27 }
 0x1c5   : > { %v655_v28 = vpop.f32.mrb[30].mxu0  ;;  %v751_v29 = vpop.f32.mrb[30].mxu1 }
 0x1c6   : > { %981 = vst [vmem:[%s2040_s12 + $0xf0] sm:$0xff] %v655_v28  ;;  %1013 = vst [vmem:[%s2040_s12 + $0x1f0] sm:$0xff] %v751_v29  ;;  %v657_v30 = vpop.f32.mrb[31].mxu0  ;;  %v753_v31 = vpop.f32.mrb[31].mxu1 }
 0x1c7   : > { %982 = vst [vmem:[%s2040_s12 + $0xf8] sm:$0xff] %v657_v30  ;;  %1014 = vst [vmem:[%s2040_s12 + $0x1f8] sm:$0xff] %v753_v31 }
 0x1c8   : > { %1483 = shalt.err (!%p1480_p11)
}
 0x1c9   : > { %s1484_s28 = scalar_lea.hbm %s2108_s23, 8192  ;;  %s1488_s26 = scalar_lea.hbm %s2239_s8, 65536 }
 0x1ca   : > { %p1485_p2 = scmp.ne.s32.totalorder %s2108_s23, %s1484_s28  ;;  %p1489_p7 = scmp.lt.u32.totalorder %s2108_s23, %s2239_s8 }
 0x1cb   : > { %p1490_p13 = scmp.lt.u32.totalorder %s1488_s26, %s1484_s28  ;;  %p1492_p1 = scmp.lt.u32.totalorder %s1484_s28, %s2108_s23 }
 0x1cc   : > { %p1486_p5 = pnand %p1485_p2, %p2240_p12 }
 0x1cd   : > { %p1491_p6 = por %p1490_p13, %p1489_p7 }
 0x1ce   : > { %p1487_p3 = pneg %p1486_p5 }
 0x1cf   : > { %p1493_p9 = por %p1492_p1, %p1491_p6 }
 0x1d1   : > { %p1494_p0 = pnand %p1493_p9, %p1487_p3 }
 0x1d3   : > { %1497 = shalt.err (!%p1494_p0)
}
 0x1d4   : > { %s1628_s18 = smov 256   ;;  %s1629_s4 = smov 1024  }
 0x1d5   : > { %s1630_s15 = smov 16  }
 0x1d6   : > { %1277 = dma.vmem_to_hbm [thread:$0]  (%p2240_p12), %s2110_s19, 8192, %s2108_s23, %s2118_s5, %s1628_s18, %s1629_s4, %s1630_s15  }
 0x1d7 PF: > { %p1291_p4 = scmp.ge.s32.totalorder %s1620_s22, 2  ;;  %s1047_s25 = sand.u32 1, %s1568_s9  }
 0x1d8   : > { %p2241_p10 = scmp.ne.s32.totalorder %s2230_s27, 0  ;;  %s1048_s2 = scalar_lea.sflag [#allocation5], %s1047_s25 }
 0x1da   : > { %p1287_p8 = pnand %p1291_p4, %p2241_p10 }
 0x1dc   : > { %1563 = dma.done.wait (!%p1287_p8), %s1048_s2, 8192  }
 0x1dd   : > { %1565 = vsyncadd (!%p1287_p8), %s1048_s2, 4294959104  ;;  %s21_s22 = sadd.s32 1, %s1620_s22   ;;  %s2243_s19 = sld [smem:[#allocation16_spill]] }
 0x1de   : > { %p2147_p11 = scmp.ge.s32.totalorder %s21_s22, 10   ;;  %s2244_s27 = sld [smem:[#allocation13_spill]] }
 0x1df   : > { %s2245_s24 = sld [smem:[#allocation14_spill]]  ;;  %s2246_s21 = sld [smem:[#allocation15_spill]] }
 0x1e0   : > { %s2247_s9 = smov %s1572_s10  ;;  %s2248_s10 = smov %s1576_s11 }
 0x1e1   : > { %s2249_s11 = smov %s1840_s30  ;;  %s2250_s12 = smov %s1584_s13 }
 0x1e2   : > { %s2251_s13 = smov %s1588_s14  ;;  %s2253_s15 = smov %s1596_s16 }
 0x1e3   : > { %s2252_s14 = smov %s2243_s19  ;;  %s2254_s16 = smov %s1600_s17 }
 0x1e4   : > { %s2255_s17 = smov %s1837_s0  ;;  %s2256_s18 = smov %s1612_s20 }
 0x1e5   : > { %s2257_s19 = smov %s2244_s27  ;;  %s2258_s20 = smov %s2245_s24 }
 0x1e6   :  { %20 = sbr.rel (!%p2147_p11) target bundleno = 15 (0xf), region = 94 }
 0x1ed   :  { %1053 = vsyncpa [#allocation4], 1 }
 0x1ee   :  { %1055 = vsyncpa [#allocation4 + $0x1], 1 }
 0x1ef   :  { %1056 = vsyncpa [#allocation7], 1 }
 0x1f0   :  { %1058 = vsyncpa [#allocation7 + $0x1], 1 }
 0x1f1   :  { %1059 = vsyncpa [#allocation5], 1 }
 0x1f2   :  { %1061 = vsyncpa [#allocation5 + $0x1], 1 }

</bundles_post_ra>
